<compile_context>
chip_gen: v7x
topology: tpu7x:2x2x1
jax: 0.10.0
libtpu: 0.0.40
codegen_flags: <defaults>
</compile_context>

<pallas_src>
import functools
import math

import jax
import jax.numpy as jnp
from jax.experimental import pallas as pl
from jax.experimental.pallas import tpu as pltpu


# ----------------------------------------------------------------------------
# Hardware-aware sizing helpers.
# ----------------------------------------------------------------------------
def _vmem_budget():
    """(vmem_limit_bytes, per-kernel block budget, logits-block target bytes)."""
    try:
        vmem_phys = int(pltpu.get_tpu_info().vmem_capacity_bytes)
    except Exception:
        vmem_phys = 64 * 1024 * 1024            # conservative: v7x per-TC VMEM
    vmem_limit = min(vmem_phys * 3 // 4, 96 * 1024 * 1024)
    block_budget = vmem_limit * 3 // 5          # headroom for compiler scratch
    x_block_target = (4 * 1024 * 1024 if vmem_phys <= 64 * 1024 * 1024
                      else 8 * 1024 * 1024)
    return vmem_limit, block_budget, x_block_target


def _keep_low_precision(dtype):
    """Keep bf16 math in-kernel only on chips with bf16 VPU/EUP (v6e/v7x)."""
    if dtype != jnp.bfloat16:
        return False
    try:
        kind = jax.devices()[0].device_kind.lower()
    except Exception:
        return True
    for old in ("v2", "v3", "v4", "v5"):
        if old in kind:
            return False
    return True


def _alpha_vector(alpha, n_classes):
    """Mirror of the PyTorch __init__ alpha handling."""
    if alpha is None:
        return jnp.ones((n_classes,), jnp.float32)
    if isinstance(alpha, (float, int)):
        assert n_classes == 2, "scalar alpha implies binary classification"
        return jnp.array([alpha, 1.0 - alpha], jnp.float32)
    a = jnp.asarray(alpha, jnp.float32).reshape(-1)
    assert a.shape[0] == n_classes
    return a


def _focal_weight(pt, gamma):
    """(1 - pt) ** gamma, using plain VPU multiplies when gamma is integral."""
    g = float(gamma)
    if g == 0.0:
        return jnp.ones_like(pt)
    base = 1.0 - pt
    if g.is_integer() and 0.0 < g <= 16.0:
        acc = base
        for _ in range(int(g) - 1):
            acc = acc * base
        return acc
    return base ** g


# ----------------------------------------------------------------------------
# Kernels.
# ----------------------------------------------------------------------------
def _focal_kernel_cfirst(x_ref, t_ref, alpha_ref, out_ref, *, gamma, n_valid,
                         keep_bf16):
    """Class-first tile: x (1,C,TM), t (1,1,TM), alpha (C,1), out (1,1,8,128).

    The pixel axis is lane-dense (128-lane axis); classes live on sublanes.
    """
    x = x_ref[0]                                             # (C, TM)
    if not keep_bf16:
        x = x.astype(jnp.float32)
    t = t_ref[0]                                             # (1, TM) int32
    c, tm = x.shape

    cls = jax.lax.broadcasted_iota(jnp.int32, (c, tm), 0)
    is_t = cls == t                                          # bool one-hot

    # Numerically-stable log-softmax over the class (sublane) axis.
    m = jnp.max(x, axis=0, keepdims=True)                    # (1, TM)
    s = jnp.sum(jnp.exp(x - m), axis=0, keepdims=True, dtype=jnp.float32)
    lse = m.astype(jnp.float32) + jnp.log(s)                 # (1, TM) f32
    xt = jnp.sum(jnp.where(is_t, x, 0), axis=0, keepdims=True,
                 dtype=jnp.float32)                          # target logit
    logpt = xt - lse
    pt = jnp.exp(logpt)
    at = jnp.sum(jnp.where(is_t, alpha_ref[...], 0.0), axis=0, keepdims=True)
    loss = -_focal_weight(pt, gamma) * (logpt * at)          # (1, TM) f32

    partial = jnp.sum(loss, axis=1, keepdims=True)           # (1, 1)
    out_ref[...] = jnp.broadcast_to(partial.reshape(1, 1, 1, 1), out_ref.shape)

    if n_valid is not None:
        # Only the last spatial tile can be partial; mask there only
        # (select, not multiply, so padded garbage / NaNs are dropped).
        j = pl.program_id(1)

        @pl.when(j == pl.num_programs(1) - 1)
        def _():
            col = j * tm + jax.lax.broadcasted_iota(jnp.int32, (1, tm), 1)
            masked = jnp.where(col < n_valid, loss, 0.0)
            p = jnp.sum(masked, axis=1, keepdims=True)
            out_ref[...] = jnp.broadcast_to(p.reshape(1, 1, 1, 1),
                                            out_ref.shape)


def _focal_kernel_clast(x_ref, t_ref, alpha_ref, out_ref, *, gamma, n_valid,
                        keep_bf16):
    """Class-last tile: x (TM,C), t (TM,1), alpha (1,C), out (1,8,128)."""
    x = x_ref[...]                                           # (TM, C)
    if not keep_bf16:
        x = x.astype(jnp.float32)
    t = t_ref[...]                                           # (TM, 1) int32
    tm, c = x.shape

    cls = jax.lax.broadcasted_iota(jnp.int32, (tm, c), 1)
    is_t = cls == t                                          # bool one-hot

    m = jnp.max(x, axis=1, keepdims=True)                    # (TM, 1)
    s = jnp.sum(jnp.exp(x - m), axis=1, keepdims=True, dtype=jnp.float32)
    lse = m.astype(jnp.float32) + jnp.log(s)
    xt = jnp.sum(jnp.where(is_t, x, 0), axis=1, keepdims=True,
                 dtype=jnp.float32)
    logpt = xt - lse                                         # (TM, 1)
    pt = jnp.exp(logpt)
    at = jnp.sum(jnp.where(is_t, alpha_ref[...], 0.0), axis=1, keepdims=True)
    loss = -_focal_weight(pt, gamma) * (logpt * at)          # (TM, 1) f32

    partial = jnp.sum(loss, axis=0, keepdims=True)           # (1, 1)
    out_ref[...] = jnp.broadcast_to(partial.reshape(1, 1, 1), out_ref.shape)

    if n_valid is not None:
        i = pl.program_id(0)

        @pl.when(i == pl.num_programs(0) - 1)
        def _():
            row = i * tm + jax.lax.broadcasted_iota(jnp.int32, (tm, 1), 0)
            masked = jnp.where(row < n_valid, loss, 0.0)
            p = jnp.sum(masked, axis=0, keepdims=True)
            out_ref[...] = jnp.broadcast_to(p.reshape(1, 1, 1), out_ref.shape)


# ----------------------------------------------------------------------------
# pallas_call wrappers.
# ----------------------------------------------------------------------------
def _run_cfirst(x3, t3, alpha_vec, gamma, keep_bf16, vmem_limit, block_budget,
                x_block_target):
    """x3 (N, C, S) native layout; pixels lane-dense; returns total loss."""
    n, c, spatial = (int(d) for d in x3.shape)
    itemsize = x3.dtype.itemsize

    # Per-lane VMEM bytes along the tiled (spatial) axis:
    #   2x double-buffered logits block                 : 2 * c * itemsize
    #   2x double-buffered (1,1,TM) i32 target (sublane pads 1->8): 2*8*4 = 64
    #   ~3 block-sized f32 temporaries inside the kernel
    per_lane = 2 * c * itemsize + 64 + 3 * c * 4
    tm = min(block_budget // per_lane, x_block_target // max(1, c * itemsize))
    tm = max(128, (tm // 128) * 128)
    if spatial <= tm:
        tm, n_valid = spatial, None
    else:
        n_valid = None if spatial % tm == 0 else spatial
    t_hw = pl.cdiv(spatial, tm)

    kernel = functools.partial(_focal_kernel_cfirst, gamma=float(gamma),
                               n_valid=n_valid, keep_bf16=keep_bf16)
    partials = pl.pallas_call(
        kernel,
        out_shape=jax.ShapeDtypeStruct((n, t_hw, 8, 128), jnp.float32),
        grid_spec=pltpu.PrefetchScalarGridSpec(
            num_scalar_prefetch=0,
            grid=(n, t_hw),
            in_specs=[
                pl.BlockSpec((1, c, tm), lambda i, j: (i, 0, j)),
                pl.BlockSpec((1, 1, tm), lambda i, j: (i, 0, j)),
                pl.BlockSpec((c, 1), lambda i, j: (0, 0)),
            ],
            out_specs=pl.BlockSpec((1, 1, 8, 128), lambda i, j: (i, j, 0, 0)),
        ),
        compiler_params=pltpu.CompilerParams(
            dimension_semantics=("parallel", "parallel"),
            vmem_limit_bytes=vmem_limit),
    )(x3, t3, alpha_vec.reshape(c, 1))
    return jnp.sum(partials[:, :, 0, 0])


def _run_clast(x2, t2, alpha_vec, gamma, keep_bf16, vmem_limit, block_budget,
               x_block_target):
    """x2 (M, C), classes already lane-dense; returns total loss."""
    m_rows, c = int(x2.shape[0]), int(x2.shape[1])
    itemsize = x2.dtype.itemsize

    # Per-row VMEM bytes along the tiled (row) axis:
    #   2x double-buffered logits block                 : 2 * c * itemsize
    #   2x double-buffered (TM,1) i32 target (lane pads 1->128): 2*128*4 = 1024
    #   ~3 block-sized f32 temporaries inside the kernel
    per_row = 2 * c * itemsize + 1024 + 3 * c * 4
    tm = min(block_budget // per_row, x_block_target // max(1, c * itemsize))
    tm = max(8, (tm // 8) * 8)
    if m_rows <= tm:
        tm, n_valid = m_rows, None
    else:
        n_valid = None if m_rows % tm == 0 else m_rows
    g_m = pl.cdiv(m_rows, tm)

    kernel = functools.partial(_focal_kernel_clast, gamma=float(gamma),
                               n_valid=n_valid, keep_bf16=keep_bf16)
    partials = pl.pallas_call(
        kernel,
        out_shape=jax.ShapeDtypeStruct((g_m, 8, 128), jnp.float32),
        grid_spec=pltpu.PrefetchScalarGridSpec(
            num_scalar_prefetch=0,
            grid=(g_m,),
            in_specs=[
                pl.BlockSpec((tm, c), lambda i: (i, 0)),
                pl.BlockSpec((tm, 1), lambda i: (i, 0)),
                pl.BlockSpec((1, c), lambda i: (0, 0)),
            ],
            out_specs=pl.BlockSpec((1, 8, 128), lambda i: (i, 0, 0)),
        ),
        compiler_params=pltpu.CompilerParams(
            dimension_semantics=("parallel",),
            vmem_limit_bytes=vmem_limit),
    )(x2, t2, alpha_vec.reshape(1, c))
    return jnp.sum(partials[:, 0, 0])


def focal_loss(x, target, *, gamma=0.0, alpha=None, size_average=True,
               _block_budget=None):
    """Pallas implementation of FocalLoss.forward.

    x:      float logits, shape (M, C) or (N, C, H, W) / (N, C, ...) NCHW-style.
    target: int class indices with N*H*W (resp. M) elements.
    _block_budget: testing-only override of the per-block VMEM budget.
    """
    x = jnp.asarray(x)
    target = jnp.asarray(target)

    vmem_limit, block_budget, x_block_target = _vmem_budget()
    if _block_budget is not None:
        block_budget = int(_block_budget)
    keep_bf16 = _keep_low_precision(x.dtype)

    if x.ndim > 2:
        # Segmentation-style input: keep native (N, C, spatial) layout,
        # class-first lane-dense kernel (no HBM transpose, no padding copies).
        n, c = int(x.shape[0]), int(x.shape[1])
        spatial = int(math.prod(x.shape[2:]))
        m_rows = n * spatial
        x3 = x.reshape(n, c, spatial)
        t3 = target.reshape(n, 1, spatial).astype(jnp.int32)
        total = _run_cfirst(x3, t3, _alpha_vector(alpha, c), gamma, keep_bf16,
                            vmem_limit, block_budget, x_block_target)
    else:
        m_rows, c = int(x.shape[0]), int(x.shape[1])
        alpha_vec = _alpha_vector(alpha, c)
        if c <= 32:
            # Small class count: class-last tiles would use only C/128 lanes
            # of every vreg.  One-time transposed copy -> lane-dense kernel.
            x3 = jnp.transpose(x, (1, 0))[None]              # (1, C, M)
            t3 = target.reshape(1, 1, m_rows).astype(jnp.int32)
            total = _run_cfirst(x3, t3, alpha_vec, gamma, keep_bf16,
                                vmem_limit, block_budget, x_block_target)
        else:
            t2 = target.reshape(m_rows, 1).astype(jnp.int32)
            total = _run_clast(x, t2, alpha_vec, gamma, keep_bf16,
                               vmem_limit, block_budget, x_block_target)

    if size_average:
        return total / jnp.float32(m_rows)
    return total


# ----------------------------------------------------------------------------
# Pure-JAX reference (mirrors the PyTorch code) and tests.
# ----------------------------------------------------------------------------
def _focal_loss_ref(x, target, *, gamma, alpha, size_average):
    x = jnp.asarray(x, jnp.float32)
    if x.ndim > 2:
        n, c = x.shape[0], x.shape[1]
        x = jnp.transpose(x.reshape(n, c, -1), (0, 2, 1)).reshape(-1, c)
    t = jnp.asarray(target).reshape(-1)
    logp = jax.nn.log_softmax(x, axis=1)
    logpt = jnp.take_along_axis(logp, t[:, None], axis=1)[:, 0]
    pt = jnp.exp(logpt)
    if alpha is not None:
        a = jnp.asarray(alpha, jnp.float32)
        logpt = logpt * a[t]
    loss = -1.0 * (1.0 - pt) ** gamma * logpt
    return loss.mean() if size_average else loss.sum()


if __name__ == "__main__":
    key = jax.random.PRNGKey(0)
    k1, k2, k3, k4, k5, k6, k7, k8 = jax.random.split(key, 8)

    # 1) Segmentation-style NCHW logits -> class-first lane-dense kernel.
    N, C, H, W = 2, 4, 16, 16
    x = jax.random.normal(k1, (N, C, H, W), jnp.float32)
    target = jax.random.randint(k2, (N, H, W), 0, C, dtype=jnp.int32)
    alpha = [0.1, 0.2, 0.3, 0.4]
    out = focal_loss(x, target, gamma=2.0, alpha=alpha, size_average=True)
    out = jax.block_until_ready(out)
    ref = _focal_loss_ref(x, target, gamma=2.0, alpha=alpha, size_average=True)
    assert jnp.allclose(out, ref, rtol=1e-5, atol=1e-5), (out, ref)

    # 2) Plain (M, C) logits with small C -> routed through the lane-dense
    #    class-first kernel (transposed once in the wrapper).
    M2, C2 = 300, 10
    x2 = jax.random.normal(k3, (M2, C2), jnp.float32)
    t2 = jax.random.randint(k4, (M2,), 0, C2, dtype=jnp.int32)
    out2 = focal_loss(x2, t2, gamma=1.5, alpha=None, size_average=False)
    out2 = jax.block_until_ready(out2)
    ref2 = _focal_loss_ref(x2, t2, gamma=1.5, alpha=None, size_average=False)
    assert jnp.allclose(out2, ref2, rtol=1e-5, atol=1e-5), (out2, ref2)

    # 3) Plain (M, C) with larger C -> class-last kernel, forced small block
    #    budget to exercise multi-tile grid + partial-last-tile masking.
    M3, C3 = 300, 256
    x3 = jax.random.normal(k5, (M3, C3), jnp.float32)
    t3 = jax.random.randint(k6, (M3,), 0, C3, dtype=jnp.int32)
    alpha3 = jnp.abs(jax.random.normal(k7, (C3,), jnp.float32)) + 0.1
    out3 = focal_loss(x3, t3, gamma=2.0, alpha=alpha3, size_average=True,
                      _block_budget=614400)
    out3 = jax.block_until_ready(out3)
    ref3 = _focal_loss_ref(x3, t3, gamma=2.0, alpha=alpha3, size_average=True)
    assert jnp.allclose(out3, ref3, rtol=1e-5, atol=1e-5), (out3, ref3)

    # 4) NCHW with forced small budget -> multi-tile spatial grid with a
    #    partial last tile on the class-first path (gamma=0, no alpha).
    N4, C4, H4, W4 = 1, 4, 20, 20
    x4 = jax.random.normal(k8, (N4, C4, H4, W4), jnp.float32)
    t4 = jax.random.randint(k2, (N4, H4, W4), 0, C4, dtype=jnp.int32)
    out4 = focal_loss(x4, t4, gamma=0.0, alpha=None, size_average=True,
                      _block_budget=20000)
    out4 = jax.block_until_ready(out4)
    ref4 = _focal_loss_ref(x4, t4, gamma=0.0, alpha=None, size_average=True)
    assert jnp.allclose(out4, ref4, rtol=1e-5, atol=1e-5), (out4, ref4)

    # 5) bf16 logits: low-precision elementwise/exp path (f32 accumulation).
    xb = jax.random.normal(k1, (2, 4, 16, 16), jnp.float32)
    tb = jax.random.randint(k4, (2, 16, 16), 0, 4, dtype=jnp.int32)
    outb = focal_loss(xb.astype(jnp.bfloat16), tb, gamma=2.0, alpha=None,
                      size_average=True)
    outb = jax.block_until_ready(outb)
    refb = _focal_loss_ref(xb.astype(jnp.bfloat16), tb, gamma=2.0, alpha=None,
                           size_average=True)
    assert jnp.allclose(outb, refb, rtol=2e-2, atol=2e-2), (outb, refb)

    print("KERNEL_OK")
</pallas_src>

<mosaic_0001>
module attributes {stable_mosaic.version = 11 : i64} {
  func.func @_focal_kernel_cfirst(%arg0: i32, %arg1: i32, %arg2: memref<1x4x256xf32, #tpu.memory_space<vmem>>, %arg3: memref<1x1x256xi32, #tpu.memory_space<vmem>>, %arg4: memref<4x1xf32, #tpu.memory_space<vmem>>, %arg5: memref<1x1x8x128xf32, #tpu.memory_space<vmem>>) attributes {dimension_semantics = [#tpu.dimension_semantics<parallel>, #tpu.dimension_semantics<parallel>], iteration_bounds = array<i64: 2, 1>, scalar_prefetch = 0 : i64, scratch_operands = 0 : i64, tpu.core_type = #tpu.core_type<tc>, window_params = [{transform_indices = @transform_0, window_bounds = array<i64: 1, 4, 256>}, {transform_indices = @transform_1, window_bounds = array<i64: 1, 1, 256>}, {pipeline_mode = #tpu.pipeline_mode<synchronous>, transform_indices = @transform_2, window_bounds = array<i64: 4, 1>}, {transform_indices = @transform_3, window_bounds = array<i64: 1, 1, 8, 128>}]} {
    %c0 = arith.constant 0 : index
    %c0_0 = arith.constant 0 : index
    %c0_1 = arith.constant 0 : index
    %0 = vector.load %arg2[%c0, %c0_0, %c0_1] : memref<1x4x256xf32, #tpu.memory_space<vmem>>, vector<1x4x256xf32>
    %1 = vector.shape_cast %0 : vector<1x4x256xf32> to vector<4x256xf32>
    %c0_2 = arith.constant 0 : index
    %c0_3 = arith.constant 0 : index
    %c0_4 = arith.constant 0 : index
    %2 = vector.load %arg3[%c0_2, %c0_3, %c0_4] : memref<1x1x256xi32, #tpu.memory_space<vmem>>, vector<1x1x256xi32>
    %3 = vector.shape_cast %2 : vector<1x1x256xi32> to vector<1x256xi32>
    %4 = tpu.iota {dimensions = array<i32: 0>} : vector<4x256xi32>
    %5 = vector.broadcast %3 : vector<1x256xi32> to vector<4x256xi32>
    %6 = arith.cmpi eq, %4, %5 : vector<4x256xi32>
    %cst = arith.constant dense<0xFF800000> : vector<256xf32>
    %7 = vector.multi_reduction <maximumf>, %1, %cst [0] : vector<4x256xf32> to vector<256xf32>
    %8 = vector.shape_cast %7 : vector<256xf32> to vector<1x256xf32>
    %9 = vector.broadcast %8 : vector<1x256xf32> to vector<4x256xf32>
    %10 = arith.subf %1, %9 : vector<4x256xf32>
    %11 = math.exp %10 : vector<4x256xf32>
    %cst_5 = arith.constant dense<0.000000e+00> : vector<256xf32>
    %12 = vector.multi_reduction <add>, %11, %cst_5 [0] : vector<4x256xf32> to vector<256xf32>
    %13 = vector.shape_cast %12 : vector<256xf32> to vector<1x256xf32>
    %14 = math.log %13 : vector<1x256xf32>
    %15 = arith.addf %8, %14 : vector<1x256xf32>
    %c0_i32 = arith.constant 0 : i32
    %16 = arith.sitofp %c0_i32 : i32 to f32
    %17 = vector.broadcast %16 : f32 to vector<4x256xf32>
    %18 = arith.select %6, %1, %17 : vector<4x256xi1>, vector<4x256xf32>
    %cst_6 = arith.constant dense<0.000000e+00> : vector<256xf32>
    %19 = vector.multi_reduction <add>, %18, %cst_6 [0] : vector<4x256xf32> to vector<256xf32>
    %20 = vector.shape_cast %19 : vector<256xf32> to vector<1x256xf32>
    %21 = arith.subf %20, %15 : vector<1x256xf32>
    %22 = math.exp %21 : vector<1x256xf32>
    %c0_7 = arith.constant 0 : index
    %c0_8 = arith.constant 0 : index
    %23 = vector.load %arg4[%c0_7, %c0_8] : memref<4x1xf32, #tpu.memory_space<vmem>>, vector<4x1xf32>
    %cst_9 = arith.constant 0.000000e+00 : f32
    %24 = vector.shape_cast %23 : vector<4x1xf32> to vector<4x1xf32>
    %25 = vector.broadcast %24 : vector<4x1xf32> to vector<4x256xf32>
    %26 = vector.broadcast %cst_9 : f32 to vector<4x256xf32>
    %27 = arith.select %6, %25, %26 : vector<4x256xi1>, vector<4x256xf32>
    %cst_10 = arith.constant dense<0.000000e+00> : vector<256xf32>
    %28 = vector.multi_reduction <add>, %27, %cst_10 [0] : vector<4x256xf32> to vector<256xf32>
    %29 = vector.shape_cast %28 : vector<256xf32> to vector<1x256xf32>
    %cst_11 = arith.constant 1.000000e+00 : f32
    %30 = vector.broadcast %cst_11 : f32 to vector<1x256xf32>
    %31 = arith.subf %30, %22 : vector<1x256xf32>
    %32 = arith.mulf %31, %31 : vector<1x256xf32>
    %cst_12 = arith.constant 0.000000e+00 : f32
    %33 = vector.broadcast %cst_12 : f32 to vector<1x256xf32>
    %34 = arith.subf %33, %32 : vector<1x256xf32>
    %35 = arith.mulf %21, %29 : vector<1x256xf32>
    %36 = arith.mulf %34, %35 : vector<1x256xf32>
    %cst_13 = arith.constant dense<0.000000e+00> : vector<1xf32>
    %37 = vector.multi_reduction <add>, %36, %cst_13 [1] : vector<1x256xf32> to vector<1xf32>
    %38 = vector.shape_cast %37 : vector<1xf32> to vector<1x1xf32>
    %39 = vector.shape_cast %38 : vector<1x1xf32> to vector<1x1x1x1xf32>
    %40 = vector.shape_cast %39 : vector<1x1x1x1xf32> to vector<1x1x1x1xf32>
    %41 = vector.broadcast %40 : vector<1x1x1x1xf32> to vector<1x1x8x128xf32>
    %c0_14 = arith.constant 0 : index
    %c0_15 = arith.constant 0 : index
    %c0_16 = arith.constant 0 : index
    %c0_17 = arith.constant 0 : index
    %42 = vector.load %arg5[%c0_14, %c0_15, %c0_16, %c0_17] : memref<1x1x8x128xf32, #tpu.memory_space<vmem>>, vector<1x1x8x128xf32>
    tpu.vector_store %arg5[%c0_14, %c0_15, %c0_16, %c0_17], %41 {strides = array<i32>} : memref<1x1x8x128xf32, #tpu.memory_space<vmem>>, vector<1x1x8x128xf32>,
    return
  }
  func.func @transform_0(%arg0: i32, %arg1: i32) -> (i32, i32, i32) {
    %c0_i32 = arith.constant 0 : i32
    %c0_i32_0 = arith.constant 0 : i32
    return %arg0, %c0_i32, %arg1 : i32, i32, i32
  }
  func.func @transform_1(%arg0: i32, %arg1: i32) -> (i32, i32, i32) {
    %c0_i32 = arith.constant 0 : i32
    %c0_i32_0 = arith.constant 0 : i32
    return %arg0, %c0_i32, %arg1 : i32, i32, i32
  }
  func.func @transform_2(%arg0: i32, %arg1: i32) -> (i32, i32) {
    %c0_i32 = arith.constant 0 : i32
    %c0_i32_0 = arith.constant 0 : i32
    %c0_i32_1 = arith.constant 0 : i32
    return %c0_i32, %c0_i32_0 : i32, i32
  }
  func.func @transform_3(%arg0: i32, %arg1: i32) -> (i32, i32, i32, i32) {
    %c0_i32 = arith.constant 0 : i32
    %c0_i32_0 = arith.constant 0 : i32
    %c0_i32_1 = arith.constant 0 : i32
    return %arg0, %arg1, %c0_i32, %c0_i32_0 : i32, i32, i32, i32
  }
}

</mosaic_0001>

<bundles_post_ra>
// kernel: tpu_custom_call.1
= control target key start
LH: loop header
LB: loop body
LE: loop exit
PB: predicated region body
PF: predicated region fallthrough
CT: control target
= control target key end

     0   :  { %8 = vsyncpa [#allocation3], 0  ;;  %s895_s0 = inlined_call_operand.hbm [shape: f32[2,4,256], index: 0, kind: input, shape index: {}]   ;;  %s896_s1 = inlined_call_operand.vmem [shape: s32[2,1,256], index: 1, kind: input, shape index: {}]   ;;  %s897_s2 = inlined_call_operand.vmem [shape: f32[4,1], index: 2, kind: input, shape index: {}]   ;;  %s898_s3 = inlined_call_operand.hbm [shape: f32[2,1,8,128], index: 3, kind: output, shape index: {}]  }
   0x1   :  { %10 = vsyncpa [#allocation3 + $0x1], 0 }
   0x2   :  { %11 = vsyncpa [#allocation4], 0 }
   0x3   :  { %13 = vsyncpa [#allocation4 + $0x1], 0  ;;  %s699_s12 = smov 0   ;;  %s701_s13 = smov 0  }
   0x4   :  { %s703_s14 = smov 0   ;;  %s705_s15 = smov 0  }
   0x5   :  { %s707_s16 = smov 0   ;;  %s709_s17 = smov 0  }
   0x6 LB: > { %s471_s18 = sadd.s32 4294967295, %s674_s17   ;;  %s472_s19 = sadd.s32 4294967294, %s674_s17   ;;  %s674_s17 = sphi %s709_s17, %s19_s17   ;;  %s670_s16 = sphi %s707_s16, %s914_s16   ;;  %s666_s15 = sphi %s705_s15, %s913_s15   ;;  %s662_s14 = sphi %s703_s14, %s912_s14   ;;  %s658_s13 = sphi %s701_s13, %s911_s13   ;;  %s654_s12 = sphi %s699_s12, %s910_s12  }
   0x7   : > { %s31_s20 = sadd.s32 1, %s670_s16  ;;  %s40_s21 = sadd.s32 1, %s662_s14 }
   0x8   : > { %p33_p0 = scmp.ge.s32.totalorder %s31_s20, 2  ;;  %p47_p1 = scmp.ne.s32.totalorder %s662_s14, %s658_s13 }
   0x9   : > { %p48_p2 = scmp.eq.s32.totalorder %s674_s17, 0  ;;  %p53_p3 = scmp.ne.s32.totalorder %s658_s13, %s654_s12 }
   0xa   : > { %s916_s20 = smov (%p33_p0, %s31_s20), 0  ;;  %p54_p5 = scmp.eq.s32.totalorder %s471_s18, 0 }
   0xb   : > { %p740_p4 = por %p48_p2, %p47_p1  ;;  %s35_s23 = ssub.s32 %s670_s16, %s916_s20 }
   0xc   : > { %p128_p6 = scmp.eq.s32.totalorder %s471_s18, 1  ;;  %p38_p7 = scmp.eq.s32.totalorder %s35_s23, 0 }
   0xd   : > { %p746_p8 = por %p54_p5, %p53_p3  ;;  %p134_p10 = scmp.eq.s32.totalorder %s472_s19, 1 }
   0xe   : > { %p750_p9 = por %p128_p6, %p47_p1  ;;  %p499_p13 = scmp.lt.s32.totalorder %s674_s17, 2 }
   0xf   : > { %s755_s26 = scalar_select %p38_p7, %s662_s14, %s40_s21  }
  0x10   : > { %s902_s25 = scalar_select %p750_p9, 1, 0 }
  0x11   : > { %p757_p11 = por %p134_p10, %p53_p3  ;;  %s157_s28 = sand.u32 1, %s662_s14  }
  0x12   : > { %s475_s29 = sshll.u32 %s157_s28, 3  ;;  %s486_s30 = sshll.u32 %s670_s16, 7 }
  0x13   : > { %s903_s27 = scalar_select %p757_p11, 1, 0 }
  0x14   : > { %s768_s6 = scalar_lea.hbm %s895_s0, %s486_s30  ;;  %s161_s7 = scalar_lea.vmem [#allocation2], %s475_s29 }
  0x15   : > { %s171_s8 = sshll.u32 %s161_s7, 4  ;;  %p774_p0 = pnand %p499_p13, %p740_p4  ;;  %s770_s8 = int_to_ptr.vmem [resolvable:$true] %s171_s8 }
  0x16   : > { %s158_s10 = scalar_lea.sflag [#allocation3], %s157_s28  ;;  %s562_s11 = scalar_lea.hbm %s768_s6, 128 }
  0x17   : > { %p563_p3 = scmp.ne.s32.totalorder %s768_s6, %s562_s11  ;;  %p564_p5 = pneg %p774_p0 }
  0x18   : > { %s567_s21 = scalar_lea.hbm %s895_s0, 256  ;;  %p568_p4 = scmp.lt.u32.totalorder %s768_s6, %s895_s0 }
  0x19   : > { %p565_p6 = pnand %p564_p5, %p563_p3  ;;  %p569_p10 = scmp.lt.u32.totalorder %s567_s21, %s562_s11 }
  0x1a   : > { %p571_p12 = scmp.lt.u32.totalorder %s562_s11, %s768_s6 }
  0x1b   : > { %p566_p7 = pneg %p565_p6  ;;  %p570_p13 = por %p569_p10, %p568_p4 }
  0x1d   : > { %p572_p1 = por %p571_p12, %p570_p13 }
  0x1f   : > { %p573_p2 = pnand %p572_p1, %p566_p7 }
  0x21   : > { %576 = shalt.err (!%p573_p2)
}
  0x22   : > { %s577_s28 = scalar_lea.vmem %s770_s8, 128  ;;  %s676_s29 = smov [#allocation2]  }
  0x23   : > { %p578_p3 = scmp.ne.s32.totalorder %s770_s8, %s577_s28  ;;  %s582_s30 = sshll.u32 %s676_s29, 4  ;;  %s583_s30 = int_to_ptr.vmem [resolvable:$false] %s582_s30 }
  0x24   : > { %s584_s4 = scalar_lea.vmem %s583_s30, 256  ;;  %p585_p9 = scmp.lt.s32.totalorder %s770_s8, %s583_s30 }
  0x25   : > { %p580_p6 = pnand %p578_p3, %p564_p5  ;;  %p586_p4 = scmp.lt.s32.totalorder %s584_s4, %s577_s28 }
  0x27   : > { %p581_p11 = pneg %p580_p6  ;;  %p587_p10 = por %p586_p4, %p585_p9 }
  0x29   : > { %p588_p12 = pnand %p587_p10, %p581_p11 }
  0x2b   : > { %591 = shalt.err (!%p588_p12)
}
  0x2c   : > { %494 = dma.hbm_to_vmem [thread:$0]  (!%p774_p0), %s768_s6, 128, %s770_s8, %s158_s10  }
  0x2d   : > { %p905_p1 = scmp.lt.s32.totalorder %s674_s17, 3  ;;  %p906_p2 = scmp.ge.s32.totalorder %s674_s17, 1 }
  0x2f   : > { %p189_p5 = pnand %p906_p2, %p905_p1 }
  0x30   : > { %s810_s5 = sand.u32 (!%p189_p5), 1, %s658_s13  }
  0x31   : > { %192 = sbr.rel (%p189_p5) target bundleno = 363 (0x16b), region = 32  ;;  %s479_s7 = sshll.u32 (!%p189_p5), %s810_s5, 3 }
  0x32   : > { %s195_s11 = scalar_lea.sflag (!%p189_p5), [#allocation3], %s810_s5  ;;  %s198_s9 = scalar_lea.vmem (!%p189_p5), [#allocation2], %s479_s7 }
  0x38   : > { %645 = dma.done.wait (%p746_p8), %s195_s11, 128  }
  0x39   : > { %647 = vsyncadd (%p746_p8), %s195_s11, 4294967168  ;;  %v677_v0 = vmov 0   ;;  %v323_v1 = vld [vmem:[%s897_s2] sm:$0xf]  ;;  %vm256_vm0 = vcmask 1043456   ;;  %p231_p8 = scmp.lt.s32.totalorder %s666_s15, 1  ;;  %v241_v23 = vlaneseq }
  0x3a   : > { %550 = vset.pattern.permute.xlu0 %v677_v0  ;;  %v239_v2 = vld [vmem:[%s198_s9] sm:$0xff]  ;;  %s228_s22 = scalar_lea.vmem [#allocation5], %s479_s7  ;;  %s483_s28 = sshll.u32 %s666_s15, 7 }
  0x3b   : > { %326 = vperm.xlu0 %550, %v323_v1   ;;  %v254_v3 = vcombine.high %v239_v2, %v239_v2  ;;  %v257_v4 = vsel %vm256_vm0, %v239_v2, -inf  ;;  %s232_s24 = scalar_select %p231_p8, %s666_s15, 1  ;;  %v242_v26 = vshrl.u32 %v241_v23, 7 }
  0x3c   : > { %v258_v6 = vrot.slane %v257_v4, 4  ;;  %s374_s23 = sshll.u32 %s228_s22, 4  ;;  %s848_s4 = scalar_lea.hbm %s898_s3, %s483_s28  ;;  %s843_s23 = int_to_ptr.vmem [resolvable:$true] %s374_s23 }
  0x3d   : > { %v264_v5 = vsel %vm256_vm0, %v254_v3, -inf  ;;  %s481_s10 = sshll.u32 %s232_s24, 1  ;;  %v245_v29 = vsub.s32 0, %v242_v26  ;;  %v249_v31 = vsub.s32 1, %v242_v26  ;;  %s360_s11 = scalar_lea.sflag [#allocation4], %s810_s5 }
  0x3e   : > { %v265_v7 = vrot.slane %v264_v5, 4  ;;  %v259_v8 = vmax.f32 %v257_v4, %v258_v6  ;;  %s237_s21 = scalar_lea.vmem %s896_s1, %s481_s10  ;;  %s592_s9 = scalar_lea.vmem %s843_s23, 128 }
  0x3f   : > { %v240_v32 = vld [vmem:[%s237_s21] sm:$0x3]  ;;  %p593_p9 = scmp.ne.s32.totalorder %s843_s23, %s592_s9  ;;  %p907_p11 = scmp.ne.s32.totalorder %s902_s25, 0 }
  0x40   : > { %v266_v9 = vmax.f32 %v264_v5, %v265_v7  ;;  %v260_v10 = vrot.slane %v259_v8, 2  ;;  %v246_v34 = vrot.slane %v240_v32, %v245_v29  ;;  %v250_v36 = vrot.slane %v240_v32, %v249_v31  ;;  %s678_s7 = smov [#allocation5]  }
  0x41   : > { %p594_p0 = pnand %p593_p9, %p907_p11  ;;  %s596_s15 = sshll.u32 %s678_s7, 4  ;;  %s597_s15 = int_to_ptr.vmem [resolvable:$false] %s596_s15 }
  0x42   : > { %v267_v11 = vrot.slane %v266_v9, 2  ;;  %v261_v13 = vmax.f32 %v259_v8, %v260_v10  ;;  %vm251_vm1 = vcmp.eq.s32.totalorder %v242_v26, %v246_v34  ;;  %vm252_vm2 = vcmp.eq.s32.totalorder %v242_v26, %v250_v36  ;;  %s598_s6 = scalar_lea.vmem %s597_s15, 256  ;;  %p599_p13 = scmp.lt.s32.totalorder %s843_s23, %s597_s15 }
  0x43   : > { %v301_v40 = vsel %vm251_vm1, %v239_v2, 0.0  ;;  %v302_v41 = vsel %vm252_vm2, %v254_v3, 0.0  ;;  %p595_p7 = pneg %p594_p0  ;;  %p600_p3 = scmp.lt.s32.totalorder %s598_s6, %s592_s9 }
  0x44   : > { %v268_v12 = vmax.f32 %v266_v9, %v267_v11  ;;  %v262_v15 = vrot.slane %v261_v13, 1  ;;  %v303_v44 = vsel %vm256_vm0, %v301_v40, 0.0  ;;  %v310_v45 = vsel %vm256_vm0, %v302_v41, 0.0 }
  0x45   : > { %v304_v47 = vrot.slane %v303_v44, 4  ;;  %v311_v49 = vrot.slane %v310_v45, 4  ;;  %p601_p6 = por %p600_p3, %p599_p13 }
  0x46   : > { %v269_v14 = vrot.slane %v268_v12, 1  ;;  %v263_v16 = vmax.f32 %v261_v13, %v262_v15 }
  0x47   : > { %v305_v50 = vadd.f32 %v304_v47, %v303_v44  ;;  %v312_v51 = vadd.f32 %v311_v49, %v310_v45  ;;  %p602_p4 = pnand %p601_p6, %p595_p7 }
  0x48   : > { %v270_v17 = vmax.f32 %v268_v12, %v269_v14 }
  0x49   : > { %v306_v52 = vrot.slane %v305_v50, 2  ;;  %v313_v53 = vrot.slane %v312_v51, 2 }
  0x4a   : > { %v273_v18 = vcombine.low %v263_v16, %v270_v17 }
  0x4b   : > { %v307_v54 = vadd.f32 %v306_v52, %v305_v50  ;;  %v314_v56 = vadd.f32 %v313_v53, %v312_v51 }
  0x4c   : > { %v275_v19 = vsub.f32 %v239_v2, %v273_v18 }
  0x4d   : > { %v308_v58 = vrot.slane %v307_v54, 1  ;;  %v315_v60 = vrot.slane %v314_v56, 1 }
  0x4e   : > { %v276_v20 = vmul.f32 1.442695, %v275_v19 }
  0x4f   : > { %v309_v63 = vadd.f32 %v308_v58, %v307_v54  ;;  %v316_v1 = vadd.f32 %v315_v60, %v314_v56 }
  0x50   : > { %552 = vpow2.f32 %v276_v20 }
  0x5a   : > { %v553_v21 = vpop.eup %552 }
  0x5b   : > { %v279_v22 = vcombine.high %v553_v21, %v553_v21  ;;  %v281_v24 = vsel %vm256_vm0, %v553_v21, 0.0 }
  0x5c   : > { %v282_v27 = vrot.slane %v281_v24, 4 }
  0x5d   : > { %v288_v25 = vsel %vm256_vm0, %v279_v22, 0.0 }
  0x5e   : > { %v289_v28 = vrot.slane %v288_v25, 4  ;;  %v283_v30 = vadd.f32 %v282_v27, %v281_v24 }
  0x60   : > { %v290_v33 = vadd.f32 %v289_v28, %v288_v25  ;;  %v284_v35 = vrot.slane %v283_v30, 2 }
  0x62   : > { %v291_v37 = vrot.slane %v290_v33, 2  ;;  %v285_v38 = vadd.f32 %v284_v35, %v283_v30 }
  0x64   : > { %v292_v39 = vadd.f32 %v291_v37, %v290_v33  ;;  %v286_v42 = vrot.slane %v285_v38, 1 }
  0x66   : > { %v293_v43 = vrot.slane %v292_v39, 1  ;;  %v287_v46 = vadd.f32 %v286_v42, %v285_v38 }
  0x68   : > { %v294_v48 = vadd.f32 %v293_v43, %v292_v39  ;;  %554 = vlog2.f32 %v287_v46 }
  0x6a   : > { %556 = vlog2.f32 %v294_v48 }
  0x72   : > { %v555_v55 = vpop.eup %554 }
  0x73   : > { %v296_v59 = vmul.f32 0.6931472, %v555_v55 }
  0x74   : > { %v557_v57 = vpop.eup %556 }
  0x75   : > { %v298_v61 = vmul.f32 0.6931472, %v557_v57  ;;  %v299_v62 = vadd.f32 %v296_v59, %v263_v16 }
  0x77   : > { %v300_v0 = vadd.f32 %v298_v61, %v270_v17  ;;  %v317_v2 = vsub.f32 %v309_v63, %v299_v62 }
  0x79   : > { %v318_v3 = vsub.f32 %v316_v1, %v300_v0  ;;  %v319_v4 = vmul.f32 1.442695, %v317_v2 }
  0x7b   : > { %v321_v5 = vmul.f32 1.442695, %v318_v3  ;;  %558 = vpow2.f32 %v319_v4 }
  0x7d   : > { %560 = vpow2.f32 %v321_v5 }
  0x85   : > { %v559_v7 = vpop.eup %558 }
  0x86   : > { %v345_v17 = vsub.f32 1.0, %v559_v7 }
  0x87   : > { %v561_v10 = vpop.eup %560 }
  0x88   : > { %v346_v18 = vsub.f32 1.0, %v561_v10  ;;  %v347_v23 = vmul.f32 %v345_v17, %v345_v17 }
  0x8a   : > { %v348_v24 = vmul.f32 %v346_v18, %v346_v18  ;;  %v349_v29 = vsub.f32 0.0, %v347_v23 }
  0x8c   : > { %v350_v30 = vsub.f32 0.0, %v348_v24 }
  0xba   : > { %v327_v6 = vpop.permute.xlu0 %326 }
  0xbb   : > { %v329_v8 = vsel %vm251_vm1, %v327_v6, 0.0  ;;  %v330_v9 = vsel %vm252_vm2, %v327_v6, 0.0 }
  0xbc   : > { %v331_v11 = vsel %vm256_vm0, %v329_v8, 0.0  ;;  %v338_v12 = vsel %vm256_vm0, %v330_v9, 0.0 }
  0xbd   : > { %v332_v13 = vrot.slane %v331_v11, 4  ;;  %v339_v14 = vrot.slane %v338_v12, 4 }
  0xbf   : > { %v333_v15 = vadd.f32 %v332_v13, %v331_v11  ;;  %v340_v16 = vadd.f32 %v339_v14, %v338_v12 }
  0xc1   : > { %v334_v19 = vrot.slane %v333_v15, 2  ;;  %v341_v20 = vrot.slane %v340_v16, 2 }
  0xc3   : > { %v335_v21 = vadd.f32 %v334_v19, %v333_v15  ;;  %v342_v22 = vadd.f32 %v341_v20, %v340_v16 }
  0xc5   : > { %v336_v25 = vrot.slane %v335_v21, 1  ;;  %v343_v26 = vrot.slane %v342_v22, 1 }
  0xc7   : > { %v337_v27 = vadd.f32 %v336_v25, %v335_v21  ;;  %v344_v28 = vadd.f32 %v343_v26, %v342_v22 }
  0xc9   : > { %v351_v31 = vmul.f32 %v337_v27, %v317_v2  ;;  %v352_v32 = vmul.f32 %v344_v28, %v318_v3 }
  0xcb   : > { %v353_v33 = vmul.f32 %v351_v31, %v349_v29  ;;  %v354_v34 = vmul.f32 %v352_v32, %v350_v30 }
  0xcd   : > { %v355_v35 = vadd.f32 %v354_v34, %v353_v33 }
  0xcf   : > { %356 = vadd.xlane.f32.xlu0 %v355_v35 }
 0x15c   : > { %v357_v36 = vpop.xlane.xlu0 %356 }
 0x15d   : > { %358 = vst [vmem:[%s228_s22] sm:$0xff] %v357_v36 }
 0x15e   : > { %605 = shalt.err (!%p602_p4)
}
 0x15f   : > { %s606_s5 = scalar_lea.hbm %s848_s4, 128  ;;  %s610_s10 = scalar_lea.hbm %s898_s3, 256 }
 0x160   : > { %p607_p10 = scmp.ne.s32.totalorder %s848_s4, %s606_s5  ;;  %p611_p2 = scmp.lt.u32.totalorder %s848_s4, %s898_s3 }
 0x161   : > { %p612_p5 = scmp.lt.u32.totalorder %s610_s10, %s606_s5  ;;  %p614_p9 = scmp.lt.u32.totalorder %s606_s5, %s848_s4 }
 0x162   : > { %p608_p12 = pnand %p607_p10, %p907_p11 }
 0x163   : > { %p613_p8 = por %p612_p5, %p611_p2 }
 0x164   : > { %p609_p1 = pneg %p608_p12 }
 0x165   : > { %p615_p0 = por %p614_p9, %p613_p8 }
 0x167   : > { %p616_p7 = pnand %p615_p0, %p609_p1 }
 0x169   : > { %619 = shalt.err (!%p616_p7)
}
 0x16a   : > { %489 = dma.vmem_to_hbm [thread:$0]  (%p907_p11), %s843_s23, 128, %s848_s4, %s360_s11  }
 0x16b PF: > { %s386_s21 = sand.u32 1, %s654_s12   ;;  %p908_p13 = scmp.ne.s32.totalorder %s903_s27, 0 }
 0x16c   : > { %p909_p3 = scmp.ge.s32.totalorder %s674_s17, 2  ;;  %s387_s22 = scalar_lea.sflag [#allocation4], %s386_s21 }
 0x16e   : > { %p496_p6 = pnand %p909_p3, %p908_p13 }
 0x170   : > { %649 = dma.done.wait (!%p496_p6), %s387_s22, 128  }
 0x171   : > { %651 = vsyncadd (!%p496_p6), %s387_s22, 4294967168  ;;  %s19_s17 = sadd.s32 1, %s674_s17   ;;  %s910_s12 = smov %s658_s13 }
 0x172   : > { %p16_p4 = scmp.ge.s32.totalorder %s19_s17, 4   ;;  %s911_s13 = smov %s662_s14 }
 0x173   : > { %s912_s14 = smov %s755_s26  ;;  %s913_s15 = smov %s670_s16 }
 0x174   : > { %s914_s16 = smov %s916_s20  ;;  %18 = sbr.rel (!%p16_p4) target bundleno = 6 (0x6), region = 80 }
 0x17b   :  { %392 = vsyncpa [#allocation3], 1 }
 0x17c   :  { %394 = vsyncpa [#allocation3 + $0x1], 1 }
 0x17d   :  { %395 = vsyncpa [#allocation4], 1 }
 0x17e   :  { %397 = vsyncpa [#allocation4 + $0x1], 1 }

</bundles_post_ra>
